<compile_context>
chip_gen: v5e
topology: v5e:2x2
jax: 0.10.0
libtpu: 0.0.40
codegen_flags: <defaults>
</compile_context>

<pallas_src>
import functools

import jax
import jax.numpy as jnp
from jax.experimental import pallas as pl
from jax.experimental.pallas import tpu as pltpu


def _meta_critic_kernel(x_ref, w1_ref, b1_ref, w2_ref, b2_ref, w3_ref, b3_ref,
                        out_ref, *, batch, block_b):
    i = pl.program_id(0)

    # Zero the resident (1,1) accumulator on the first batch tile.
    @pl.when(i == 0)
    def _():
        out_ref[...] = jnp.zeros_like(out_ref)

    # bf16 weights halve the dominant HBM->VMEM traffic; upcast in vregs and
    # accumulate in f32 (numerically close to the f32 reference).
    x = x_ref[...]
    w1 = w1_ref[...].astype(jnp.float32)
    w2 = w2_ref[...].astype(jnp.float32)

    h1 = jnp.dot(x, w1, preferred_element_type=jnp.float32) + b1_ref[...]
    h1 = jnp.maximum(h1, 0.0)
    h2 = jnp.dot(h1, w2, preferred_element_type=jnp.float32) + b2_ref[...]
    h2 = jnp.maximum(h2, 0.0)

    # Mask rows past the true batch size (the last tile may be padded with
    # unspecified data when block_b does not divide B).
    row = i * block_b + jax.lax.broadcasted_iota(jnp.int32, (block_b, 1), 0)
    h2 = jnp.where(row < batch, h2, 0.0)

    # Fused layer 3 + mean:  mean(h2 @ w3 + b3) = (sum_rows(h2) . w3) / B + b3.
    # Pure VPU/XLU reduction -- no N=1 MXU pass, no masked matmul store.
    colsum = jnp.sum(h2, axis=0, keepdims=True)                       # [1, 256]
    partial = jnp.sum(colsum * w3_ref[...], axis=-1, keepdims=True)   # [1, 1]
    out_ref[...] += partial

    # Finalize on the last tile: divide by true batch and add the layer-3 bias.
    @pl.when(i == pl.num_programs(0) - 1)
    def _():
        out_ref[...] = out_ref[...] * (1.0 / batch) + b3_ref[...]


def meta_critic_forward(x, params, *, block_b=512):
    """x: [B, state_dim] f32. Returns scalar f32 (mean of critic output)."""
    w1, b1, w2, b2, w3, b3 = params
    batch, state_dim = x.shape

    # Single block when B is small (no grid overhead); otherwise 512-row tiles
    # (multiple of 8 sublanes) with weights pinned in VMEM across the grid.
    blk = batch if batch <= block_b else block_b
    grid = (pl.cdiv(batch, blk),)

    kernel = functools.partial(_meta_critic_kernel, batch=batch, block_b=blk)

    out = pl.pallas_call(
        kernel,
        out_shape=jax.ShapeDtypeStruct((1, 1), jnp.float32),
        grid_spec=pltpu.PrefetchScalarGridSpec(
            num_scalar_prefetch=0,
            grid=grid,
            in_specs=[
                pl.BlockSpec((blk, state_dim), lambda i: (i, 0)),  # x tile
                pl.BlockSpec(w1.shape, lambda i: (0, 0)),          # weights stay
                pl.BlockSpec(b1.shape, lambda i: (0, 0)),          # resident
                pl.BlockSpec(w2.shape, lambda i: (0, 0)),
                pl.BlockSpec(b2.shape, lambda i: (0, 0)),
                pl.BlockSpec(w3.shape, lambda i: (0, 0)),
                pl.BlockSpec(b3.shape, lambda i: (0, 0)),
            ],
            out_specs=pl.BlockSpec((1, 1), lambda i: (0, 0)),      # accumulator
        ),
        compiler_params=pltpu.CompilerParams(
            dimension_semantics=("arbitrary",)),
    )(x, w1, b1, w2, b2, w3, b3)
    return out[0, 0]


def init_params(key, state_dim, neurons=(512, 256, 1)):
    """PyTorch-style uniform(+/- 1/sqrt(fan_in)) init.

    w1, w2 are stored pre-transposed [in, out] in bfloat16 (HBM-traffic win);
    w3 is stored as [1, 256] (PyTorch layout) for the fused VPU reduction;
    biases are f32 [1, out].
    """
    dims = (state_dim,) + tuple(neurons)
    raw = []
    for li in range(3):
        fan_in, fan_out = dims[li], dims[li + 1]
        key, kw, kb = jax.random.split(key, 3)
        bound = 1.0 / (fan_in ** 0.5)
        w = jax.random.uniform(kw, (fan_in, fan_out), jnp.float32,
                               minval=-bound, maxval=bound)
        b = jax.random.uniform(kb, (1, fan_out), jnp.float32,
                               minval=-bound, maxval=bound)
        raw.extend([w, b])
    w1, b1, w2, b2, w3, b3 = raw
    return (w1.astype(jnp.bfloat16), b1,
            w2.astype(jnp.bfloat16), b2,
            w3.T, b3)


if __name__ == "__main__":
    key = jax.random.PRNGKey(0)
    k_x, k_p, k_big = jax.random.split(key, 3)

    batch, state_dim = 8, 32
    params = init_params(k_p, state_dim)
    w1, b1, w2, b2, w3, b3 = params
    w1f = w1.astype(jnp.float32)
    w2f = w2.astype(jnp.float32)

    def reference(xv):
        h = jnp.maximum(xv @ w1f + b1, 0.0)
        h = jnp.maximum(h @ w2f + b2, 0.0)
        return jnp.mean(h @ w3.T + b3)

    # Small-batch case (single block, grid of 1).
    x = jax.random.normal(k_x, (batch, state_dim), jnp.float32)
    out = meta_critic_forward(x, params)
    jax.block_until_ready(out)
    ref = reference(x)
    assert jnp.allclose(out, ref, atol=2e-4, rtol=2e-4), (out, ref)

    # Larger batch: exercises the batch grid, VMEM-resident weights and the
    # tail-tile masking (1000 is not a multiple of the 512-row tile).
    x_big = jax.random.normal(k_big, (1000, state_dim), jnp.float32)
    out_big = meta_critic_forward(x_big, params)
    jax.block_until_ready(out_big)
    ref_big = reference(x_big)
    assert jnp.allclose(out_big, ref_big, atol=2e-4, rtol=2e-4), (out_big, ref_big)

    print("KERNEL_OK")
</pallas_src>

<mosaic_0001>
module attributes {stable_mosaic.version = 11 : i64} {
  func.func @_meta_critic_kernel(%arg0: i32, %arg1: memref<8x32xf32, #tpu.memory_space<vmem>>, %arg2: memref<32x512xbf16, #tpu.memory_space<vmem>>, %arg3: memref<1x512xf32, #tpu.memory_space<vmem>>, %arg4: memref<512x256xbf16, #tpu.memory_space<vmem>>, %arg5: memref<1x256xf32, #tpu.memory_space<vmem>>, %arg6: memref<1x256xf32, #tpu.memory_space<vmem>>, %arg7: memref<1x1xf32, #tpu.memory_space<vmem>>, %arg8: memref<1x1xf32, #tpu.memory_space<vmem>>) attributes {dimension_semantics = [#tpu.dimension_semantics<arbitrary>], iteration_bounds = array<i64: 1>, scalar_prefetch = 0 : i64, scratch_operands = 0 : i64, tpu.core_type = #tpu.core_type<tc>, window_params = [{transform_indices = @transform_0, window_bounds = array<i64: 8, 32>}, {pipeline_mode = #tpu.pipeline_mode<synchronous>, transform_indices = @transform_1, window_bounds = array<i64: 32, 512>}, {pipeline_mode = #tpu.pipeline_mode<synchronous>, transform_indices = @transform_2, window_bounds = array<i64: 1, 512>}, {pipeline_mode = #tpu.pipeline_mode<synchronous>, transform_indices = @transform_3, window_bounds = array<i64: 512, 256>}, {pipeline_mode = #tpu.pipeline_mode<synchronous>, transform_indices = @transform_4, window_bounds = array<i64: 1, 256>}, {pipeline_mode = #tpu.pipeline_mode<synchronous>, transform_indices = @transform_5, window_bounds = array<i64: 1, 256>}, {pipeline_mode = #tpu.pipeline_mode<synchronous>, transform_indices = @transform_6, window_bounds = array<i64: 1, 1>}, {pipeline_mode = #tpu.pipeline_mode<synchronous>, transform_indices = @transform_7, window_bounds = array<i64: 1, 1>}]} {
    %c0_i32 = arith.constant 0 : i32
    %0 = arith.cmpi eq, %arg0, %c0_i32 : i32
    %1 = arith.extui %0 : i1 to i32
    %c0_i32_0 = arith.constant 0 : i32
    %2 = arith.cmpi ne, %1, %c0_i32_0 : i32
    scf.if %2 {
      %cst_25 = arith.constant 0.000000e+00 : f32
      %42 = vector.broadcast %cst_25 : f32 to vector<1x1xf32>
      %c0_26 = arith.constant 0 : index
      %c0_27 = arith.constant 0 : index
      %43 = vector.load %arg8[%c0_26, %c0_27] : memref<1x1xf32, #tpu.memory_space<vmem>>, vector<1x1xf32>
      tpu.vector_store %arg8[%c0_26, %c0_27], %42 {strides = array<i32>} : memref<1x1xf32, #tpu.memory_space<vmem>>, vector<1x1xf32>,
    } else {
    }
    %c0 = arith.constant 0 : index
    %c0_1 = arith.constant 0 : index
    %3 = vector.load %arg1[%c0, %c0_1] : memref<8x32xf32, #tpu.memory_space<vmem>>, vector<8x32xf32>
    %c0_2 = arith.constant 0 : index
    %c0_3 = arith.constant 0 : index
    %4 = vector.load %arg2[%c0_2, %c0_3] : memref<32x512xbf16, #tpu.memory_space<vmem>>, vector<32x512xbf16>
    %5 = arith.extf %4 : vector<32x512xbf16> to vector<32x512xf32>
    %c0_4 = arith.constant 0 : index
    %c0_5 = arith.constant 0 : index
    %6 = vector.load %arg4[%c0_4, %c0_5] : memref<512x256xbf16, #tpu.memory_space<vmem>>, vector<512x256xbf16>
    %7 = arith.extf %6 : vector<512x256xbf16> to vector<512x256xf32>
    %cst = arith.constant dense<0.000000e+00> : vector<8x512xf32>
    %8 = tpu.matmul %3, %5, %cst {dimension_numbers = #tpu.dot_dimension_numbers<[1], [0], [0], [1], [0, 0, 1, 1], [], []>} : vector<8x32xf32>, vector<32x512xf32>, vector<8x512xf32> -> vector<8x512xf32>
    %c0_6 = arith.constant 0 : index
    %c0_7 = arith.constant 0 : index
    %9 = vector.load %arg3[%c0_6, %c0_7] : memref<1x512xf32, #tpu.memory_space<vmem>>, vector<1x512xf32>
    %10 = vector.broadcast %9 : vector<1x512xf32> to vector<8x512xf32>
    %11 = arith.addf %8, %10 : vector<8x512xf32>
    %cst_8 = arith.constant 0.000000e+00 : f32
    %12 = vector.broadcast %cst_8 : f32 to vector<8x512xf32>
    %13 = arith.maximumf %11, %12 : vector<8x512xf32>
    %cst_9 = arith.constant dense<0.000000e+00> : vector<8x256xf32>
    %14 = tpu.matmul %13, %7, %cst_9 {dimension_numbers = #tpu.dot_dimension_numbers<[1], [0], [0], [1], [0, 0, 1, 1], [], []>} : vector<8x512xf32>, vector<512x256xf32>, vector<8x256xf32> -> vector<8x256xf32>
    %c0_10 = arith.constant 0 : index
    %c0_11 = arith.constant 0 : index
    %15 = vector.load %arg5[%c0_10, %c0_11] : memref<1x256xf32, #tpu.memory_space<vmem>>, vector<1x256xf32>
    %16 = vector.broadcast %15 : vector<1x256xf32> to vector<8x256xf32>
    %17 = arith.addf %14, %16 : vector<8x256xf32>
    %cst_12 = arith.constant 0.000000e+00 : f32
    %18 = vector.broadcast %cst_12 : f32 to vector<8x256xf32>
    %19 = arith.maximumf %17, %18 : vector<8x256xf32>
    %c8_i32 = arith.constant 8 : i32
    %20 = arith.muli %arg0, %c8_i32 : i32
    %21 = tpu.iota {dimensions = array<i32: 0>} : vector<8x1xi32>
    %22 = vector.broadcast %20 : i32 to vector<8x1xi32>
    %23 = arith.addi %22, %21 : vector<8x1xi32>
    %c8_i32_13 = arith.constant 8 : i32
    %24 = vector.broadcast %c8_i32_13 : i32 to vector<8x1xi32>
    %25 = arith.cmpi slt, %23, %24 : vector<8x1xi32>
    %cst_14 = arith.constant 0.000000e+00 : f32
    %26 = vector.shape_cast %25 : vector<8x1xi1> to vector<8x1xi1>
    %27 = vector.broadcast %26 : vector<8x1xi1> to vector<8x256xi1>
    %28 = vector.broadcast %cst_14 : f32 to vector<8x256xf32>
    %29 = arith.select %27, %19, %28 : vector<8x256xi1>, vector<8x256xf32>
    %cst_15 = arith.constant dense<0.000000e+00> : vector<256xf32>
    %30 = vector.multi_reduction <add>, %29, %cst_15 [0] : vector<8x256xf32> to vector<256xf32>
    %31 = vector.shape_cast %30 : vector<256xf32> to vector<1x256xf32>
    %c0_16 = arith.constant 0 : index
    %c0_17 = arith.constant 0 : index
    %32 = vector.load %arg6[%c0_16, %c0_17] : memref<1x256xf32, #tpu.memory_space<vmem>>, vector<1x256xf32>
    %33 = arith.mulf %31, %32 : vector<1x256xf32>
    %cst_18 = arith.constant dense<0.000000e+00> : vector<1xf32>
    %34 = vector.multi_reduction <add>, %33, %cst_18 [1] : vector<1x256xf32> to vector<1xf32>
    %35 = vector.shape_cast %34 : vector<1xf32> to vector<1x1xf32>
    %c0_19 = arith.constant 0 : index
    %c0_20 = arith.constant 0 : index
    %36 = vector.load %arg8[%c0_19, %c0_20] : memref<1x1xf32, #tpu.memory_space<vmem>>, vector<1x1xf32>
    %37 = arith.addf %36, %35 : vector<1x1xf32>
    %c0_21 = arith.constant 0 : index
    %c0_22 = arith.constant 0 : index
    %38 = vector.load %arg8[%c0_21, %c0_22] : memref<1x1xf32, #tpu.memory_space<vmem>>, vector<1x1xf32>
    tpu.vector_store %arg8[%c0_21, %c0_22], %37 {strides = array<i32>} : memref<1x1xf32, #tpu.memory_space<vmem>>, vector<1x1xf32>,
    %c0_i32_23 = arith.constant 0 : i32
    %39 = arith.cmpi eq, %arg0, %c0_i32_23 : i32
    %40 = arith.extui %39 : i1 to i32
    %c0_i32_24 = arith.constant 0 : i32
    %41 = arith.cmpi ne, %40, %c0_i32_24 : i32
    scf.if %41 {
      %c0_25 = arith.constant 0 : index
      %c0_26 = arith.constant 0 : index
      %42 = vector.load %arg8[%c0_25, %c0_26] : memref<1x1xf32, #tpu.memory_space<vmem>>, vector<1x1xf32>
      %cst_27 = arith.constant 1.250000e-01 : f32
      %43 = vector.broadcast %cst_27 : f32 to vector<1x1xf32>
      %44 = arith.mulf %42, %43 : vector<1x1xf32>
      %c0_28 = arith.constant 0 : index
      %c0_29 = arith.constant 0 : index
      %45 = vector.load %arg7[%c0_28, %c0_29] : memref<1x1xf32, #tpu.memory_space<vmem>>, vector<1x1xf32>
      %46 = arith.addf %44, %45 : vector<1x1xf32>
      %c0_30 = arith.constant 0 : index
      %c0_31 = arith.constant 0 : index
      %47 = vector.load %arg8[%c0_30, %c0_31] : memref<1x1xf32, #tpu.memory_space<vmem>>, vector<1x1xf32>
      tpu.vector_store %arg8[%c0_30, %c0_31], %46 {strides = array<i32>} : memref<1x1xf32, #tpu.memory_space<vmem>>, vector<1x1xf32>,
    } else {
    }
    return
  }
  func.func @transform_0(%arg0: i32) -> (i32, i32) {
    %c0_i32 = arith.constant 0 : i32
    %c0_i32_0 = arith.constant 0 : i32
    return %arg0, %c0_i32 : i32, i32
  }
  func.func @transform_1(%arg0: i32) -> (i32, i32) {
    %c0_i32 = arith.constant 0 : i32
    %c0_i32_0 = arith.constant 0 : i32
    %c0_i32_1 = arith.constant 0 : i32
    return %c0_i32, %c0_i32_0 : i32, i32
  }
  func.func @transform_2(%arg0: i32) -> (i32, i32) {
    %c0_i32 = arith.constant 0 : i32
    %c0_i32_0 = arith.constant 0 : i32
    %c0_i32_1 = arith.constant 0 : i32
    return %c0_i32, %c0_i32_0 : i32, i32
  }
  func.func @transform_3(%arg0: i32) -> (i32, i32) {
    %c0_i32 = arith.constant 0 : i32
    %c0_i32_0 = arith.constant 0 : i32
    %c0_i32_1 = arith.constant 0 : i32
    return %c0_i32, %c0_i32_0 : i32, i32
  }
  func.func @transform_4(%arg0: i32) -> (i32, i32) {
    %c0_i32 = arith.constant 0 : i32
    %c0_i32_0 = arith.constant 0 : i32
    %c0_i32_1 = arith.constant 0 : i32
    return %c0_i32, %c0_i32_0 : i32, i32
  }
  func.func @transform_5(%arg0: i32) -> (i32, i32) {
    %c0_i32 = arith.constant 0 : i32
    %c0_i32_0 = arith.constant 0 : i32
    %c0_i32_1 = arith.constant 0 : i32
    return %c0_i32, %c0_i32_0 : i32, i32
  }
  func.func @transform_6(%arg0: i32) -> (i32, i32) {
    %c0_i32 = arith.constant 0 : i32
    %c0_i32_0 = arith.constant 0 : i32
    %c0_i32_1 = arith.constant 0 : i32
    return %c0_i32, %c0_i32_0 : i32, i32
  }
  func.func @transform_7(%arg0: i32) -> (i32, i32) {
    %c0_i32 = arith.constant 0 : i32
    %c0_i32_0 = arith.constant 0 : i32
    %c0_i32_1 = arith.constant 0 : i32
    return %c0_i32, %c0_i32_0 : i32, i32
  }
}

</mosaic_0001>

<bundles_post_ra>
// kernel: tpu_custom_call.1
= control target key start
LH: loop header
LB: loop body
LE: loop exit
PB: predicated region body
PF: predicated region fallthrough
CT: control target
= control target key end

     0   :  { %s1123_s0 = inlined_call_operand.hbm [shape: f32[8,32], index: 0, kind: input, shape index: {}]   ;;  %s1124_s1 = inlined_call_operand.hbm [shape: bf16[32,512], index: 1, kind: input, shape index: {}]   ;;  %s1125_s2 = inlined_call_operand.hbm [shape: f32[1,512], index: 2, kind: input, shape index: {}]   ;;  %s1126_s3 = inlined_call_operand.hbm [shape: bf16[512,256], index: 3, kind: input, shape index: {}]   ;;  %s1127_s4 = inlined_call_operand.vmem [shape: f32[1,256], index: 4, kind: input, shape index: {}]   ;;  %s1128_s5 = inlined_call_operand.vmem [shape: f32[1,256], index: 5, kind: input, shape index: {}]   ;;  %s1129_s6 = inlined_call_operand.<no memory space> [shape: f32[1,1], index: 6, kind: input, shape index: {}]   ;;  %s1130_s7 = inlined_call_operand.hbm [shape: f32[1,1], index: 7, kind: output, shape index: {}]  }
   0x1   :  { %v12_v0 = vstv %s1129_s6 }
   0x2   :  { %13 = vst [vmem:[#allocation2] sm:$0x1] %v12_v0 }
   0x3   :  { %14 = vsyncpa [#allocation4], 0 }
   0x4   :  { %15 = vsyncpa [#allocation7], 0 }
   0x5   :  { %16 = vsyncpa [#allocation10], 0  ;;  %s33_s28 = sshll.u32 %s1124_s1, 4  ;;  %s34_s28 = int_to_ptr.hbm [resolvable:$true] %s33_s28 }
   0x6   :  { %17 = vsyncpa [#allocation5], 0  ;;  %s786_s29 = smov [#allocation6]   ;;  %s23_s10 = sshll.u32 %s1123_s0, 4  ;;  %s24_s10 = int_to_ptr.hbm [resolvable:$true] %s23_s10 }
   0x7   :  { %s35_s30 = sshll.u32 %s786_s29, 4  ;;  %s787_s11 = smov 256   ;;  %s36_s30 = int_to_ptr.vmem [resolvable:$true] %s35_s30 }
   0x8   :  { %s788_s12 = smov 16   ;;  %s789_s6 = smov [#allocation3]  }
   0x9   :  { %41 = dma.hbm_to_vmem [thread:$0]  %s34_s28, 1024, %s36_s30, [#allocation7], %s787_s11, %s787_s11, %s788_s12  }
   0xa   :  { %s25_s13 = sshll.u32 %s789_s6, 4  ;;  %s47_s16 = sshll.u32 %s1125_s2, 4  ;;  %s26_s13 = int_to_ptr.vmem [resolvable:$true] %s25_s13  ;;  %s48_s16 = int_to_ptr.hbm [resolvable:$true] %s47_s16 }
   0xb   :  { %28 = dma.hbm_to_vmem [thread:$0]  %s24_s10, 128, %s26_s13, [#allocation4]  }
   0xc   :  { %s57_s18 = sshll.u32 %s1126_s3, 4  ;;  %s790_s19 = smov [#allocation8]   ;;  %s58_s18 = int_to_ptr.hbm [resolvable:$true] %s57_s18 }
   0xd   :  { %s49_s20 = sshll.u32 %s790_s19, 4  ;;  %s791_s0 = smov [#allocation9]   ;;  %s50_s20 = int_to_ptr.vmem [resolvable:$true] %s49_s20 }
   0xe   :  { %52 = dma.hbm_to_vmem [thread:$0]  %s48_s16, 64, %s50_s20, [#allocation7]  }
   0xf   :  { %s59_s21 = sshll.u32 %s791_s0, 4  ;;  %s792_s22 = smov 128   ;;  %s60_s21 = int_to_ptr.vmem [resolvable:$true] %s59_s21 }
  0x10   :  { %s793_s23 = smov 8  }
  0x11   :  { %65 = dma.hbm_to_vmem [thread:$0]  %s58_s18, 8192, %s60_s21, [#allocation10], %s792_s22, %s792_s22, %s793_s23  }
  0x12   :  { %778 = dma.done.wait [#allocation4], 128  }
  0x13   :  { %779 = vsyncadd [#allocation4], 4294967168 }
  0x14   :  { %780 = dma.done.wait [#allocation7], 1088  }
  0x15   :  { %781 = vsyncadd [#allocation7], 4294966208 }
  0x16   :  { %782 = dma.done.wait [#allocation10], 8192  }
  0x17   :  { %783 = vsyncadd [#allocation10], 4294959104  ;;  %v101_v1 = vld [vmem:[#allocation6 + $0x30] sm:$0xff]  ;;  %v102_v2 = vld [vmem:[#allocation6 + $0x38] sm:$0xff]  ;;  %vm321_vm0 = vcmask 261120   ;;  %vm92_vm1 = vcmask 0  }
  0x18   :  { %v99_v3 = vld [vmem:[#allocation6 + $0x20] sm:$0xff]  ;;  %v115_v4 = vunpack.c.l.bf16 %v101_v1  ;;  %v117_v5 = vunpack.c.l.bf16 %v102_v2  ;;  %v118_v6 = vunpack.c.h.bf16 %v102_v2  ;;  %v100_v8 = vld [vmem:[#allocation6 + $0x28] sm:$0xff]  ;;  %v97_v9 = vld [vmem:[#allocation6 + $0x10] sm:$0xff]  ;;  %v116_v11 = vunpack.c.h.bf16 %v101_v1  ;;  %s632_s28 = sshll.u32 %s1130_s7, 4  ;;  %s633_s28 = int_to_ptr.hbm [resolvable:$true] %s632_s28 }
  0x19   :  { %v111_v7 = vunpack.c.l.bf16 %v99_v3  ;;  %v98_v10 = vld [vmem:[#allocation6 + $0x18] sm:$0xff]  ;;  %v113_v12 = vunpack.c.l.bf16 %v100_v8  ;;  %v114_v13 = vunpack.c.h.bf16 %v100_v8  ;;  %v95_v14 = vld [vmem:[#allocation6] sm:$0xff]  ;;  %v96_v15 = vld [vmem:[#allocation6 + $0x8] sm:$0xff]  ;;  %v107_v16 = vunpack.c.l.bf16 %v97_v9 }
  0x1a   :  { %337 = vmatpush.msra.mxu0 %v115_v4  ;;  %377 = vmatpush.msra.mxu2 %v117_v5  ;;  %v112_v17 = vunpack.c.h.bf16 %v99_v3  ;;  %v109_v18 = vunpack.c.l.bf16 %v98_v10  ;;  %v110_v19 = vunpack.c.h.bf16 %v98_v10  ;;  %v108_v20 = vunpack.c.h.bf16 %v97_v9  ;;  %v851_v23 = vld [vmem:[#allocation9 + $0x78] sm:$0xff]  ;;  %v855_v27 = vld [vmem:[#allocation9 + $0x70] sm:$0xff]  ;;  %v864_v33 = vld [vmem:[#allocation9 + $0x68] sm:$0xff] }
  0x1b   :  { %397 = vmatpush.msra.mxu3 %v118_v6  ;;  %357 = vmatpush.msra.mxu1 %v116_v11  ;;  %v103_v21 = vunpack.c.l.bf16 %v95_v14  ;;  %v105_v22 = vunpack.c.l.bf16 %v96_v15  ;;  %v106_v24 = vunpack.c.h.bf16 %v96_v15  ;;  %v853_v25 = vld [vmem:[#allocation9 + $0x178] sm:$0xff]  ;;  %v104_v29 = vunpack.c.h.bf16 %v95_v14  ;;  %v862_v32 = vld [vmem:[#allocation9 + $0x170] sm:$0xff]  ;;  %v874_v39 = vld [vmem:[#allocation9 + $0x168] sm:$0xff] }
  0x1c   :  { %338 = vmatpush.msra.mxu0 %v111_v7  ;;  %378 = vmatpush.msra.mxu2 %v113_v12  ;;  %v94_v26 = vld [vmem:[#allocation3] sm:$0xff]  ;;  %v213_v30 = vunpack.c.l.bf16 %v851_v23  ;;  %v277_v35 = vunpack.c.l.bf16 %v853_v25  ;;  %v211_v36 = vunpack.c.l.bf16 %v855_v27  ;;  %v878_v40 = vld [vmem:[#allocation9 + $0x60] sm:$0xff]  ;;  %v880_v41 = vld [vmem:[#allocation9 + $0xe8] sm:$0xff]  ;;  %v275_v43 = vunpack.c.l.bf16 %v862_v32 }
  0x1d   :  { %398 = vmatpush.msra.mxu3 %v114_v13  ;;  %358 = vmatpush.msra.mxu1 %v112_v17  ;;  %v857_v28 = vld [vmem:[#allocation9 + $0xf8] sm:$0xff]  ;;  %v866_v34 = vld [vmem:[#allocation9 + $0xf0] sm:$0xff]  ;;  %v209_v44 = vunpack.c.l.bf16 %v864_v33  ;;  %v886_v46 = vld [vmem:[#allocation9 + $0x1e8] sm:$0xff]  ;;  %v273_v51 = vunpack.c.l.bf16 %v874_v39  ;;  %v207_v52 = vunpack.c.l.bf16 %v878_v40  ;;  %v241_v53 = vunpack.c.l.bf16 %v880_v41 }
  0x1e   :  { %339 = vmatpush.msra.mxu0 %v107_v16  ;;  %379 = vmatpush.msra.mxu2 %v109_v18  ;;  %v860_v31 = vld [vmem:[#allocation9 + $0x1f8] sm:$0xff]  ;;  %v245_v37 = vunpack.c.l.bf16 %v857_v28  ;;  %v872_v38 = vld [vmem:[#allocation9 + $0x1f0] sm:$0xff]  ;;  %v243_v45 = vunpack.c.l.bf16 %v866_v34  ;;  %v888_v47 = vld [vmem:[#allocation9 + $0x160] sm:$0xff]  ;;  %v305_v58 = vunpack.c.l.bf16 %v886_v46  ;;  %vm607_vm2 = vcmask 1040384  }
  0x1f   :  { %399 = vmatpush.msra.mxu3 %v110_v19  ;;  %359 = vmatpush.msra.mxu1 %v108_v20  ;;  %v309_v42 = vunpack.c.l.bf16 %v860_v31  ;;  %v891_v48 = vld [vmem:[#allocation9 + $0x58] sm:$0xff]  ;;  %v893_v49 = vld [vmem:[#allocation9 + $0xe0] sm:$0xff]  ;;  %v307_v50 = vunpack.c.l.bf16 %v872_v38  ;;  %v903_v56 = vld [vmem:[#allocation9 + $0x50] sm:$0xff]  ;;  %v271_v59 = vunpack.c.l.bf16 %v888_v47 }
  0x20   :  { %340 = vmatpush.msra.mxu0 %v103_v21  ;;  %380 = vmatpush.msra.mxu2 %v105_v22  ;;  %v899_v54 = vld [vmem:[#allocation9 + $0x1e0] sm:$0xff]  ;;  %v901_v55 = vld [vmem:[#allocation9 + $0x158] sm:$0xff]  ;;  %v205_v60 = vunpack.c.l.bf16 %v891_v48  ;;  %v239_v61 = vunpack.c.l.bf16 %v893_v49  ;;  %v913_v63 = vld [vmem:[#allocation9 + $0x150] sm:$0xff]  ;;  %v203_v4 = vunpack.c.l.bf16 %v903_v56 }
  0x21   :  { %400 = vmatpush.msra.mxu3 %v106_v24  ;;  %644 = vmatmul.msk.f32.vlgmr.msra.gmra.mxu0 %vm321_vm0, %v94_v26  ;;  %v905_v57 = vld [vmem:[#allocation9 + $0xd8] sm:$0xff]  ;;  %v915_v0 = vld [vmem:[#allocation9 + $0x48] sm:$0xff]  ;;  %v917_v1 = vld [vmem:[#allocation9 + $0xd0] sm:$0xff]  ;;  %v303_v2 = vunpack.c.l.bf16 %v899_v54  ;;  %v269_v3 = vunpack.c.l.bf16 %v901_v55  ;;  %v267_v11 = vunpack.c.l.bf16 %v913_v63 }
  0x22   :  { %646 = vmatmul.msk.f32.vlgmr.msra.gmra.mxu2 %vm321_vm0, %v94_v26  ;;  %647 = vmatmul.msk.f32.vlgmr.msra.gmra.mxu3 %vm321_vm0, %v94_v26  ;;  %v911_v62 = vld [vmem:[#allocation9 + $0x1d8] sm:$0xff]  ;;  %v237_v5 = vunpack.c.l.bf16 %v905_v57  ;;  %v923_v6 = vld [vmem:[#allocation9 + $0x1d0] sm:$0xff]  ;;  %v925_v7 = vld [vmem:[#allocation9 + $0x148] sm:$0xff]  ;;  %v201_v12 = vunpack.c.l.bf16 %v915_v0  ;;  %v235_v13 = vunpack.c.l.bf16 %v917_v1 }
  0x23   :  { %360 = vmatpush.msra.mxu1 %v104_v29  ;;  %415 = vmatpush.msrb.mxu0 %v213_v30  ;;  %v927_v8 = vld [vmem:[#allocation9 + $0x40] sm:$0xff]  ;;  %v929_v9 = vld [vmem:[#allocation9 + $0xc8] sm:$0xff]  ;;  %v301_v10 = vunpack.c.l.bf16 %v911_v62  ;;  %v939_v16 = vld [vmem:[#allocation9 + $0x38] sm:$0xff]  ;;  %v299_v18 = vunpack.c.l.bf16 %v923_v6  ;;  %v265_v19 = vunpack.c.l.bf16 %v925_v7 }
  0x24   :  { %645 = vmatmul.msk.f32.vlgmr.msra.gmra.mxu1 %vm321_vm0, %v94_v26  ;;  %455 = vmatpush.msrb.mxu2 %v277_v35  ;;  %v935_v14 = vld [vmem:[#allocation9 + $0x1c8] sm:$0xff]  ;;  %v937_v15 = vld [vmem:[#allocation9 + $0x140] sm:$0xff]  ;;  %v199_v20 = vunpack.c.l.bf16 %v927_v8  ;;  %v233_v21 = vunpack.c.l.bf16 %v929_v9  ;;  %v949_v24 = vld [vmem:[#allocation9 + $0x138] sm:$0xff] }
  0x25   :  { %416 = vmatpush.msrb.mxu0 %v211_v36  ;;  %435 = vmatpush.msrb.mxu1 %v245_v37  ;;  %v941_v17 = vld [vmem:[#allocation9 + $0xc0] sm:$0xff]  ;;  %v951_v26 = vld [vmem:[#allocation9 + $0x30] sm:$0xff]  ;;  %v953_v29 = vld [vmem:[#allocation9 + $0xb8] sm:$0xff]  ;;  %v297_v30 = vunpack.c.l.bf16 %v935_v14  ;;  %v263_v35 = vunpack.c.l.bf16 %v937_v15  ;;  %v197_v36 = vunpack.c.l.bf16 %v939_v16 }
  0x26   :  { %475 = vmatpush.msrb.mxu3 %v309_v42  ;;  %456 = vmatpush.msrb.mxu2 %v275_v43  ;;  %v947_v22 = vld [vmem:[#allocation9 + $0x1c0] sm:$0xff]  ;;  %v231_v37 = vunpack.c.l.bf16 %v941_v17  ;;  %v959_v42 = vld [vmem:[#allocation9 + $0x1b8] sm:$0xff]  ;;  %v961_v43 = vld [vmem:[#allocation9 + $0x130] sm:$0xff] }
  0x27   :  { %417 = vmatpush.msrb.mxu0 %v209_v44  ;;  %436 = vmatpush.msrb.mxu1 %v243_v45  ;;  %v963_v44 = vld [vmem:[#allocation9 + $0x28] sm:$0xff]  ;;  %v965_v45 = vld [vmem:[#allocation9 + $0xb0] sm:$0xff] }
  0x28   :  { %476 = vmatpush.msrb.mxu3 %v307_v50  ;;  %457 = vmatpush.msrb.mxu2 %v273_v51  ;;  %v295_v50 = vunpack.c.l.bf16 %v947_v22  ;;  %v261_v51 = vunpack.c.l.bf16 %v949_v24 }
  0x29   :  { %418 = vmatpush.msrb.mxu0 %v207_v52  ;;  %437 = vmatpush.msrb.mxu1 %v241_v53  ;;  %v195_v52 = vunpack.c.l.bf16 %v951_v26  ;;  %v229_v53 = vunpack.c.l.bf16 %v953_v29 }
  0x2a   :  { %477 = vmatpush.msrb.mxu3 %v305_v58  ;;  %458 = vmatpush.msrb.mxu2 %v271_v59  ;;  %v971_v58 = vld [vmem:[#allocation9 + $0x1b0] sm:$0xff]  ;;  %v973_v59 = vld [vmem:[#allocation9 + $0x128] sm:$0xff] }
  0x2b   :  { %419 = vmatpush.msrb.mxu0 %v205_v60  ;;  %438 = vmatpush.msrb.mxu1 %v239_v61  ;;  %1145 = vst [vmem:[#allocation16_spill] sm:$0xff] %v971_v58  ;;  %v975_v60 = vld [vmem:[#allocation9 + $0x20] sm:$0xff]  ;;  %v977_v61 = vld [vmem:[#allocation9 + $0xa8] sm:$0xff] }
  0x2c   :  { %478 = vmatpush.msrb.mxu3 %v303_v2  ;;  %459 = vmatpush.msrb.mxu2 %v269_v3  ;;  %1146 = vst [vmem:[#allocation17_spill] sm:$0xff] %v973_v59  ;;  %v293_v2 = vunpack.c.l.bf16 %v959_v42  ;;  %v259_v3 = vunpack.c.l.bf16 %v961_v43 }
  0x2d   :  { %420 = vmatpush.msrb.mxu0 %v203_v4  ;;  %439 = vmatpush.msrb.mxu1 %v237_v5  ;;  %1147 = vst [vmem:[#allocation18_spill] sm:$0xff] %v977_v61  ;;  %v193_v4 = vunpack.c.l.bf16 %v963_v44  ;;  %v227_v5 = vunpack.c.l.bf16 %v965_v45 }
  0x2e   :  { %479 = vmatpush.msrb.mxu3 %v301_v10  ;;  %460 = vmatpush.msrb.mxu2 %v267_v11  ;;  %v983_v10 = vld [vmem:[#allocation9 + $0x1a8] sm:$0xff]  ;;  %v985_v11 = vld [vmem:[#allocation9 + $0x120] sm:$0xff] }
  0x2f   :  { %421 = vmatpush.msrb.mxu0 %v201_v12  ;;  %440 = vmatpush.msrb.mxu1 %v235_v13  ;;  %1148 = vst [vmem:[#allocation19_spill] sm:$0xff] %v983_v10  ;;  %v987_v12 = vld [vmem:[#allocation9 + $0x18] sm:$0xff]  ;;  %v989_v13 = vld [vmem:[#allocation9 + $0xa0] sm:$0xff] }
  0x30   :  { %480 = vmatpush.msrb.mxu3 %v299_v18  ;;  %461 = vmatpush.msrb.mxu2 %v265_v19  ;;  %1149 = vst [vmem:[#allocation20_spill] sm:$0xff] %v985_v11  ;;  %v291_v18 = vunpack.c.l.bf16 %v971_v58  ;;  %v257_v19 = vunpack.c.l.bf16 %v973_v59  ;;  %v1007_v59 = vld [vmem:[#allocation9 + $0x198] sm:$0xff]  ;;  %v1009_v58 = vld [vmem:[#allocation9 + $0x110] sm:$0xff] }
  0x31   :  { %422 = vmatpush.msrb.mxu0 %v199_v20  ;;  %441 = vmatpush.msrb.mxu1 %v233_v21  ;;  %1150 = vst [vmem:[#allocation21_spill] sm:$0xff] %v987_v12  ;;  %v191_v20 = vunpack.c.l.bf16 %v975_v60  ;;  %v225_v21 = vunpack.c.l.bf16 %v977_v61  ;;  %v1037_v61 = vld [vmem:[#allocation9 + $0x100] sm:$0xff] }
  0x32   :  { %481 = vmatpush.msrb.mxu3 %v297_v30  ;;  %462 = vmatpush.msrb.mxu2 %v263_v35  ;;  %1151 = vst [vmem:[#allocation22_spill] sm:$0xff] %v989_v13  ;;  %v995_v30 = vld [vmem:[#allocation9 + $0x1a0] sm:$0xff]  ;;  %v997_v35 = vld [vmem:[#allocation9 + $0x118] sm:$0xff] }
  0x33   :  { %423 = vmatpush.msrb.mxu0 %v197_v36  ;;  %442 = vmatpush.msrb.mxu1 %v231_v37  ;;  %1152 = vst [vmem:[#allocation23_spill] sm:$0xff] %v995_v30  ;;  %v999_v36 = vld [vmem:[#allocation9 + $0x10] sm:$0xff]  ;;  %v1001_v37 = vld [vmem:[#allocation9 + $0x98] sm:$0xff] }
  0x34   :  { %482 = vmatpush.msrb.mxu3 %v295_v50  ;;  %463 = vmatpush.msrb.mxu2 %v261_v51  ;;  %1153 = vst [vmem:[#allocation24_spill] sm:$0xff] %v997_v35  ;;  %v289_v50 = vunpack.c.l.bf16 %v983_v10  ;;  %v255_v51 = vunpack.c.l.bf16 %v985_v11  ;;  %v287_v10 = vunpack.c.l.bf16 %v995_v30  ;;  %v253_v11 = vunpack.c.l.bf16 %v997_v35 }
  0x35   :  { %424 = vmatpush.msrb.mxu0 %v195_v52  ;;  %443 = vmatpush.msrb.mxu1 %v229_v53  ;;  %1154 = vst [vmem:[#allocation25_spill] sm:$0xff] %v999_v36  ;;  %v189_v52 = vunpack.c.l.bf16 %v987_v12  ;;  %v223_v53 = vunpack.c.l.bf16 %v989_v13  ;;  %v1019_v13 = vld [vmem:[#allocation9 + $0x190] sm:$0xff]  ;;  %v1021_v12 = vld [vmem:[#allocation9 + $0x108] sm:$0xff]  ;;  %v285_v30 = vunpack.c.l.bf16 %v1007_v59  ;;  %v251_v35 = vunpack.c.l.bf16 %v1009_v58 }
  0x36   :  { %483 = vmatpush.msrb.mxu3 %v293_v2  ;;  %464 = vmatpush.msrb.mxu2 %v259_v3  ;;  %1155 = vst [vmem:[#allocation26_spill] sm:$0xff] %v1001_v37  ;;  %v1011_v2 = vld [vmem:[#allocation9 + $0x8] sm:$0xff]  ;;  %v1013_v3 = vld [vmem:[#allocation9 + $0x90] sm:$0xff] }
  0x37   :  { %425 = vmatpush.msrb.mxu0 %v193_v4  ;;  %444 = vmatpush.msrb.mxu1 %v227_v5  ;;  %1156 = vst [vmem:[#allocation27_spill] sm:$0xff] %v1009_v58  ;;  %v187_v4 = vunpack.c.l.bf16 %v999_v36  ;;  %v221_v5 = vunpack.c.l.bf16 %v1001_v37  ;;  %v1031_v37 = vld [vmem:[#allocation9 + $0x188] sm:$0xff]  ;;  %v249_v36 = vunpack.c.l.bf16 %v1021_v12  ;;  %v214_v58 = vunpack.c.h.bf16 %v851_v23 }
  0x38   :  { %484 = vmatpush.msrb.mxu3 %v291_v18  ;;  %465 = vmatpush.msrb.mxu2 %v257_v19  ;;  %1157 = vst [vmem:[#allocation28_spill] sm:$0xff] %v1019_v13  ;;  %v1023_v18 = vld [vmem:[#allocation9] sm:$0xff]  ;;  %v1025_v19 = vld [vmem:[#allocation9 + $0x88] sm:$0xff]  ;;  %v278_v23 = vunpack.c.h.bf16 %v853_v25  ;;  %v242_v25 = vunpack.c.h.bf16 %v880_v41  ;;  %v204_v41 = vunpack.c.h.bf16 %v903_v56  ;;  %v268_v56 = vunpack.c.h.bf16 %v913_v63 }
  0x39   :  { %426 = vmatpush.msrb.mxu0 %v191_v20  ;;  %445 = vmatpush.msrb.mxu1 %v225_v21  ;;  %1158 = vst [vmem:[#allocation29_spill] sm:$0xff] %v1021_v12  ;;  %v185_v20 = vunpack.c.l.bf16 %v1011_v2  ;;  %v219_v21 = vunpack.c.l.bf16 %v1013_v3  ;;  %v298_v63 = vunpack.c.h.bf16 %v935_v14  ;;  %v228_v14 = vunpack.c.h.bf16 %v965_v45  ;;  %v1162_v45 = vld [vmem:[#allocation21_spill] sm:$0xff] }
  0x3a   :  { %485 = vmatpush.msrb.mxu3 %v289_v50  ;;  %466 = vmatpush.msrb.mxu2 %v255_v51  ;;  %v1033_v50 = vld [vmem:[#allocation9 + $0x80] sm:$0xff]  ;;  %v283_v51 = vunpack.c.l.bf16 %v1019_v13  ;;  %v247_v13 = vunpack.c.l.bf16 %v1037_v61 }
  0x3b   :  { %427 = vmatpush.msrb.mxu0 %v189_v52  ;;  %446 = vmatpush.msrb.mxu1 %v223_v53  ;;  %v183_v52 = vunpack.c.l.bf16 %v1023_v18  ;;  %v217_v53 = vunpack.c.l.bf16 %v1025_v19  ;;  %v215_v12 = vunpack.c.l.bf16 %v1033_v50 }
  0x3c   :  { %486 = vmatpush.msrb.mxu3 %v287_v10  ;;  %467 = vmatpush.msrb.mxu2 %v253_v11  ;;  %v281_v10 = vunpack.c.l.bf16 %v1031_v37  ;;  %v1043_v11 = vld [vmem:[#allocation9 + $0x180] sm:$0xff] }
  0x3d   :  { %428 = vmatpush.msrb.mxu0 %v187_v4  ;;  %447 = vmatpush.msrb.mxu1 %v221_v5  ;;  %v212_v4 = vunpack.c.h.bf16 %v855_v27  ;;  %v246_v5 = vunpack.c.h.bf16 %v857_v28  ;;  %v276_v27 = vunpack.c.h.bf16 %v862_v32  ;;  %v208_v28 = vunpack.c.h.bf16 %v878_v40 }
  0x3e   :  { %487 = vmatpush.msrb.mxu3 %v285_v30  ;;  %468 = vmatpush.msrb.mxu2 %v251_v35  ;;  %v279_v30 = vunpack.c.l.bf16 %v1043_v11  ;;  %v210_v35 = vunpack.c.h.bf16 %v864_v33  ;;  %v274_v33 = vunpack.c.h.bf16 %v874_v39  ;;  %v306_v32 = vunpack.c.h.bf16 %v886_v46 }
  0x3f   :  { %429 = vmatpush.msrb.mxu0 %v185_v20  ;;  %448 = vmatpush.msrb.mxu1 %v219_v21  ;;  %v244_v20 = vunpack.c.h.bf16 %v866_v34  ;;  %v310_v21 = vunpack.c.h.bf16 %v860_v31  ;;  %v206_v34 = vunpack.c.h.bf16 %v891_v48  ;;  %v240_v31 = vunpack.c.h.bf16 %v893_v49 }
  0x40   :  { %488 = vmatpush.msrb.mxu3 %v283_v51  ;;  %469 = vmatpush.msrb.mxu2 %v249_v36  ;;  %v308_v36 = vunpack.c.h.bf16 %v872_v38  ;;  %v272_v40 = vunpack.c.h.bf16 %v888_v47  ;;  %v238_v38 = vunpack.c.h.bf16 %v905_v57  ;;  %v304_v39 = vunpack.c.h.bf16 %v899_v54 }
  0x41   :  { %430 = vmatpush.msrb.mxu0 %v183_v52  ;;  %449 = vmatpush.msrb.mxu1 %v217_v53  ;;  %v270_v48 = vunpack.c.h.bf16 %v901_v55  ;;  %v202_v49 = vunpack.c.h.bf16 %v915_v0  ;;  %v236_v46 = vunpack.c.h.bf16 %v917_v1  ;;  %v302_v47 = vunpack.c.h.bf16 %v911_v62  ;;  %v1163_v52 = vld [vmem:[#allocation22_spill] sm:$0xff] }
  0x42   :  { %489 = vmatpush.msrb.mxu3 %v281_v10  ;;  %470 = vmatpush.msrb.mxu2 %v247_v13  ;;  %v200_v57 = vunpack.c.h.bf16 %v927_v8  ;;  %v234_v54 = vunpack.c.h.bf16 %v929_v9  ;;  %v300_v55 = vunpack.c.h.bf16 %v923_v6  ;;  %v266_v0 = vunpack.c.h.bf16 %v925_v7  ;;  %v1161_v13 = vld [vmem:[#allocation17_spill] sm:$0xff]  ;;  %v1165_v10 = vld [vmem:[#allocation20_spill] sm:$0xff] }
  0x43   :  { %495 = vmatpush.msra.mxu0 %v214_v58  ;;  %450 = vmatpush.msrb.mxu1 %v215_v12  ;;  %v198_v1 = vunpack.c.h.bf16 %v939_v16  ;;  %v232_v62 = vunpack.c.h.bf16 %v941_v17  ;;  %v264_v8 = vunpack.c.h.bf16 %v937_v15  ;;  %v196_v9 = vunpack.c.h.bf16 %v951_v26  ;;  %v1159_v58 = vld [vmem:[#allocation18_spill] sm:$0xff] }
  0x44   :  { %490 = vmatpush.msrb.mxu3 %v279_v30  ;;  %535 = vmatpush.msra.mxu2 %v278_v23  ;;  %v230_v6 = vunpack.c.h.bf16 %v953_v29  ;;  %v296_v7 = vunpack.c.h.bf16 %v947_v22  ;;  %v262_v16 = vunpack.c.h.bf16 %v949_v24  ;;  %v194_v17 = vunpack.c.h.bf16 %v963_v44  ;;  %v1160_v24 = vld [vmem:[#allocation16_spill] sm:$0xff]  ;;  %v1167_v23 = vld [vmem:[#allocation26_spill] sm:$0xff] }
  0x45   :  { %496 = vmatpush.msra.mxu0 %v212_v4  ;;  %515 = vmatpush.msra.mxu1 %v246_v5  ;;  %v294_v15 = vunpack.c.h.bf16 %v959_v42  ;;  %v260_v26 = vunpack.c.h.bf16 %v961_v43  ;;  %v192_v29 = vunpack.c.h.bf16 %v975_v60  ;;  %v226_v22 = vunpack.c.h.bf16 %v1159_v58  ;;  %v1164_v43 = vld [vmem:[#allocation19_spill] sm:$0xff]  ;;  %v1166_v4 = vld [vmem:[#allocation25_spill] sm:$0xff] }
  0x46   :  { %555 = vmatpush.msra.mxu3 %v310_v21  ;;  %536 = vmatpush.msra.mxu2 %v276_v27  ;;  %v292_v12 = vunpack.c.h.bf16 %v1160_v24  ;;  %v258_v44 = vunpack.c.h.bf16 %v1161_v13  ;;  %v190_v51 = vunpack.c.h.bf16 %v1162_v45  ;;  %v224_v42 = vunpack.c.h.bf16 %v1163_v52  ;;  %v1169_v21 = vld [vmem:[#allocation24_spill] sm:$0xff] }
  0x47   :  { %497 = vmatpush.msra.mxu0 %v210_v35  ;;  %516 = vmatpush.msra.mxu1 %v244_v20  ;;  %v290_v53 = vunpack.c.h.bf16 %v1164_v43  ;;  %v256_v60 = vunpack.c.h.bf16 %v1165_v10  ;;  %v188_v5 = vunpack.c.h.bf16 %v1166_v4  ;;  %v222_v30 = vunpack.c.h.bf16 %v1167_v23  ;;  %v1168_v35 = vld [vmem:[#allocation23_spill] sm:$0xff] }
  0x48   :  { %556 = vmatpush.msra.mxu3 %v308_v36  ;;  %537 = vmatpush.msra.mxu2 %v274_v33  ;;  %v288_v20 = vunpack.c.h.bf16 %v1168_v35  ;;  %v254_v27 = vunpack.c.h.bf16 %v1169_v21  ;;  %v286_v36 = vunpack.c.h.bf16 %v1007_v59  ;;  %v1170_v33 = vld [vmem:[#allocation27_spill] sm:$0xff]  ;;  %v282_v59 = vunpack.c.h.bf16 %v1031_v37 }
  0x49   :  { %498 = vmatpush.msra.mxu0 %v208_v28  ;;  %517 = vmatpush.msra.mxu1 %v242_v25  ;;  %v186_v28 = vunpack.c.h.bf16 %v1011_v2  ;;  %v220_v25 = vunpack.c.h.bf16 %v1013_v3  ;;  %v216_v3 = vunpack.c.h.bf16 %v1033_v50 }
  0x4a   :  { %557 = vmatpush.msra.mxu3 %v306_v32  ;;  %538 = vmatpush.msra.mxu2 %v272_v40  ;;  %v218_v32 = vunpack.c.h.bf16 %v1025_v19  ;;  %v1171_v40 = vld [vmem:[#allocation28_spill] sm:$0xff]  ;;  %v311_v19 = vld [vmem:[#allocation8] sm:$0xf] }
  0x4b   :  { %499 = vmatpush.msra.mxu0 %v206_v34  ;;  %518 = vmatpush.msra.mxu1 %v240_v31  ;;  %v252_v34 = vunpack.c.h.bf16 %v1170_v33  ;;  %v184_v31 = vunpack.c.h.bf16 %v1023_v18  ;;  %v280_v18 = vunpack.c.h.bf16 %v1043_v11  ;;  %v313_v50 = vperm.slane %v311_v19, 0 }
  0x4c   :  { %558 = vmatpush.msra.mxu3 %v304_v39  ;;  %539 = vmatpush.msra.mxu2 %v270_v48  ;;  %v248_v39 = vunpack.c.h.bf16 %v1037_v61 }
  0x4d   :  { %500 = vmatpush.msra.mxu0 %v204_v41  ;;  %519 = vmatpush.msra.mxu1 %v238_v38  ;;  %v284_v41 = vunpack.c.h.bf16 %v1171_v40  ;;  %v1172_v38 = vld [vmem:[#allocation29_spill] sm:$0xff] }
  0x4e   :  { %559 = vmatpush.msra.mxu3 %v302_v47  ;;  %540 = vmatpush.msra.mxu2 %v268_v56  ;;  %v250_v2 = vunpack.c.h.bf16 %v1172_v38  ;;  %v315_v56 = vperm.slane %v311_v19, 2 }
  0x4f   :  { %501 = vmatpush.msra.mxu0 %v202_v49  ;;  %520 = vmatpush.msra.mxu1 %v236_v46  ;;  %v314_v49 = vperm.slane %v311_v19, 1 }
  0x50   :  { %560 = vmatpush.msra.mxu3 %v300_v55  ;;  %541 = vmatpush.msra.mxu2 %v266_v0 }
  0x51   :  { %502 = vmatpush.msra.mxu0 %v200_v57  ;;  %521 = vmatpush.msra.mxu1 %v234_v54  ;;  %v316_v57 = vperm.slane %v311_v19, 3 }
  0x52   :  { %561 = vmatpush.msra.mxu3 %v298_v63  ;;  %542 = vmatpush.msra.mxu2 %v264_v8  ;;  %v409_v8 = vld [vmem:[%s1127_s4] sm:$0x3] }
  0x53   :  { %503 = vmatpush.msra.mxu0 %v198_v1  ;;  %522 = vmatpush.msra.mxu1 %v232_v62 }
  0x54   :  { %562 = vmatpush.msra.mxu3 %v296_v7  ;;  %543 = vmatpush.msra.mxu2 %v262_v16 }
  0x55   :  { %504 = vmatpush.msra.mxu0 %v196_v9  ;;  %523 = vmatpush.msra.mxu1 %v230_v6  ;;  %v411_v9 = vperm.slane %v409_v8, 0 }
  0x56   :  { %563 = vmatpush.msra.mxu3 %v294_v15  ;;  %544 = vmatpush.msra.mxu2 %v260_v26 }
  0x57   :  { %505 = vmatpush.msra.mxu0 %v194_v17  ;;  %524 = vmatpush.msra.mxu1 %v228_v14  ;;  %v412_v14 = vperm.slane %v409_v8, 1 }
  0x58   :  { %564 = vmatpush.msra.mxu3 %v292_v12  ;;  %545 = vmatpush.msra.mxu2 %v258_v44 }
  0x59   :  { %506 = vmatpush.msra.mxu0 %v192_v29  ;;  %525 = vmatpush.msra.mxu1 %v226_v22  ;;  %v794_v22 = vmov 0.0  }
  0x5a   :  { %565 = vmatpush.msra.mxu3 %v290_v53  ;;  %546 = vmatpush.msra.mxu2 %v256_v60  ;;  %93 = vst.msk [vmem:[#allocation11] sm:$0x1] %vm92_vm1, %v794_v22 }
  0x5b   :  { %507 = vmatpush.msra.mxu0 %v190_v51  ;;  %526 = vmatpush.msra.mxu1 %v224_v42 }
  0x5c   :  { %566 = vmatpush.msra.mxu3 %v288_v20  ;;  %547 = vmatpush.msra.mxu2 %v254_v27  ;;  %v599_v20 = vld [vmem:[%s1128_s5] sm:$0x3]  ;;  %s795_s5 = smov [#allocation11]  }
  0x5d   :  { %508 = vmatpush.msra.mxu0 %v188_v5  ;;  %527 = vmatpush.msra.mxu1 %v222_v30  ;;  %v602_v33 = vperm.slane %v599_v20, 1  ;;  %s630_s25 = sshll.u32 %s795_s5, 4  ;;  %s631_s25 = int_to_ptr.vmem [resolvable:$true] %s630_s25 }
  0x5e   :  { %567 = vmatpush.msra.mxu3 %v286_v36  ;;  %548 = vmatpush.msra.mxu2 %v252_v34 }
  0x5f   :  { %509 = vmatpush.msra.mxu0 %v186_v28  ;;  %528 = vmatpush.msra.mxu1 %v220_v25  ;;  %v601_v25 = vperm.slane %v599_v20, 0 }
  0x60   :  { %568 = vmatpush.msra.mxu3 %v284_v41  ;;  %549 = vmatpush.msra.mxu2 %v250_v2 }
  0x61   :  { %510 = vmatpush.msra.mxu0 %v184_v31  ;;  %529 = vmatpush.msra.mxu1 %v218_v32  ;;  %v613_v2 = vld [vmem:[#allocation11] sm:$0x1] }
  0x62   :  { %569 = vmatpush.msra.mxu3 %v282_v59  ;;  %550 = vmatpush.msra.mxu2 %v248_v39 }
  0x63   :  { %530 = vmatpush.msra.mxu1 %v216_v3 }
  0x64   :  { %570 = vmatpush.msra.mxu3 %v280_v18  ;;  %v622_v18 = vld [vmem:[#allocation2] sm:$0x1] }
  0x9e   :  { %v342_v48 = vpop.f32.mrf.mxu0 }
  0x9f   :  { %v343_v46 = vadd.f32 %v342_v48, %v313_v50 }
  0xa1   :  { %v405_v37 = vmax.f32 %v343_v46, 0.0  ;;  %v362_v47 = vpop.f32.mrf.mxu1 }
  0xa2   :  { %v363_v61 = vadd.f32 %v362_v47, %v314_v49 }
  0xa3   :  { %431 = vmatmul.f32.vlgmr.msrb.gmra.mxu0 %v405_v37 }
  0xa4   :  { %v406_v54 = vmax.f32 %v363_v61, 0.0 }
  0xa5   :  { %v382_v55 = vpop.f32.mrf.mxu2  ;;  %v402_v11 = vpop.f32.mrf.mxu3 }
  0xa6   :  { %v383_v0 = vadd.f32 %v382_v55, %v315_v56  ;;  %v403_v1 = vadd.f32 %v402_v11, %v316_v57  ;;  %451 = vmatmul.f32.vlgmr.msrb.gmra.mxu1 %v406_v54 }
  0xa8   :  { %v407_v62 = vmax.f32 %v383_v0, 0.0  ;;  %v408_v63 = vmax.f32 %v403_v1, 0.0 }
  0xaa   :  { %471 = vmatmul.f32.vlgmr.msrb.gmra.mxu2 %v407_v62  ;;  %491 = vmatmul.f32.vlgmr.msrb.gmra.mxu3 %v408_v63 }
  0xab   :  { %511 = vmatmul.f32.vlgmr.msra.gmra.mxu0 %v405_v37 }
  0xae   :  { %531 = vmatmul.f32.vlgmr.msra.gmra.mxu1 %v406_v54 }
  0xb2   :  { %551 = vmatmul.f32.vlgmr.msra.gmra.mxu2 %v407_v62  ;;  %571 = vmatmul.f32.vlgmr.msra.gmra.mxu3 %v408_v63 }
 0x120   :  { %v432_v6 = vpop.f32.mrf.mxu0 }
 0x121   :  { %v433_v7 = vadd.f32 %v432_v6, %v411_v9 }
 0x123   :  { %v452_v16 = vpop.f32.mrf.mxu1 }
 0x124   :  { %v453_v17 = vadd.f32 %v452_v16, %v433_v7 }
 0x128   :  { %v512_v15 = vpop.f32.mrf.mxu0 }
 0x129   :  { %v513_v24 = vadd.f32 %v512_v15, %v412_v14 }
 0x12b   :  { %v532_v13 = vpop.f32.mrf.mxu1 }
 0x12c   :  { %v533_v45 = vadd.f32 %v532_v13, %v513_v24 }
 0x12d   :  { %v472_v26 = vpop.f32.mrf.mxu2  ;;  %v492_v29 = vpop.f32.mrf.mxu3 }
 0x12e   :  { %v473_v58 = vadd.f32 %v472_v26, %v453_v17 }
 0x130   :  { %v493_v12 = vadd.f32 %v492_v29, %v473_v58 }
 0x132   :  { %v575_v44 = vmax.f32 %v493_v12, 0.0 }
 0x134   :  { %v587_v51 = vrot.slane %v575_v44, 4 }
 0x135   :  { %v552_v52 = vpop.f32.mrf.mxu2  ;;  %v572_v53 = vpop.f32.mrf.mxu3 }
 0x136   :  { %v588_v42 = vadd.f32 %v587_v51, %v575_v44  ;;  %v553_v43 = vadd.f32 %v552_v52, %v533_v45 }
 0x138   :  { %v589_v10 = vrot.slane %v588_v42, 2  ;;  %v573_v60 = vadd.f32 %v572_v53, %v553_v43 }
 0x13a   :  { %v590_v4 = vadd.f32 %v589_v10, %v588_v42  ;;  %v576_v5 = vmax.f32 %v573_v60, 0.0 }
 0x13c   :  { %v593_v23 = vrot.slane %v576_v5, 4  ;;  %v591_v35 = vrot.slane %v590_v4, 1 }
 0x13e   :  { %v594_v30 = vadd.f32 %v593_v23, %v576_v5  ;;  %v592_v28 = vadd.f32 %v591_v35, %v590_v4 }
 0x140   :  { %v595_v21 = vrot.slane %v594_v30, 2  ;;  %v605_v31 = vmul.f32 %v601_v25, %v592_v28 }
 0x142   :  { %v596_v27 = vadd.f32 %v595_v21, %v594_v30  ;;  %v608_v40 = vsel %vm607_vm2, %v605_v31, 0.0 }
 0x144   :  { %v597_v36 = vrot.slane %v596_v27, 1 }
 0x146   :  { %v598_v34 = vadd.f32 %v597_v36, %v596_v27 }
 0x148   :  { %v606_v32 = vmul.f32 %v602_v33, %v598_v34 }
 0x14a   :  { %v609_v41 = vsel %vm607_vm2, %v606_v32, 0.0 }
 0x14b   :  { %v610_v38 = vadd.f32 %v609_v41, %v608_v40 }
 0x14d   :  { %611 = vadd.xlane.f32.xlu0 %v610_v38 }
 0x1c0   :  { %v612_v3 = vpop.xlane.xlu0 %611 }
 0x1c1   :  { %v614_v59 = vadd.f32 %v613_v2, %v612_v3 }
 0x1c3   :  { %616 = vst.msk [vmem:[#allocation11] sm:$0x1] %vm92_vm1, %v614_v59 }
 0x1ca   :  { %v620_v39 = vld [vmem:[#allocation11] sm:$0x1] }
 0x1cb   :  { %v621_v19 = vmul.f32 0.125, %v620_v39 }
 0x1cd   :  { %v623_v50 = vadd.f32 %v622_v18, %v621_v19 }
 0x1cf   :  { %624 = vst.msk [vmem:[#allocation11] sm:$0x1] %vm92_vm1, %v623_v50 }
 0x1d0   :  { %635 = dma.vmem_to_hbm [thread:$0]  %s631_s25, 16, %s633_s28, [#allocation5]  }
 0x1d1   :  { %784 = dma.done.wait [#allocation5], 16  }
 0x1d2   :  { %785 = vsyncadd [#allocation5], 4294967280 }
 0x1d3   :  { %640 = vsyncpa [#allocation4], 1 }
 0x1d4   :  { %641 = vsyncpa [#allocation7], 1 }
 0x1d5   :  { %642 = vsyncpa [#allocation10], 1 }
 0x1d6   :  { %643 = vsyncpa [#allocation5], 1 }

</bundles_post_ra>
